<compile_context>
chip_gen: v6e
topology: v6e:2x2x1
jax: 0.10.0
libtpu: 0.0.40
codegen_flags: <defaults>
</compile_context>

<pallas_src>
import jax
import jax.numpy as jnp
from jax.experimental import pallas as pl
from jax.experimental.pallas import tpu as pltpu

LANE = 128  # vreg lane width / MXU column granularity


def mlp_kernel(x_ref, w1_ref, w23_ref, b_ref, o_ref):
    """Fused 3-layer MLP for one batch tile.

    x_ref  : [bb, n_in]  bf16
    w1_ref : [n_in, P]   bf16 (zero-padded columns)
    w23_ref: [2, P, P]   bf16 (w2 and w3, zero-padded)
    b_ref  : [3, P]      f32  (b1, b2, b3 rows, zero-padded)
    o_ref  : [bb, P]     output dtype (lane-dense; padded cols are exactly 0 + 0 bias)
    """
    x = x_ref[...]

    # Layer 1: bf16 matmul on MXU, f32 accumulate; bias-add/ReLU in f32 (v5e-friendly).
    h1 = jnp.dot(x, w1_ref[...], preferred_element_type=jnp.float32) + b_ref[0:1, :]
    h1 = jnp.maximum(h1, 0.0).astype(jnp.bfloat16)

    # Layer 2
    h2 = jnp.dot(h1, w23_ref[0], preferred_element_type=jnp.float32) + b_ref[1:2, :]
    h2 = jnp.maximum(h2, 0.0).astype(jnp.bfloat16)

    # Layer 3 (no activation)
    out = jnp.dot(h2, w23_ref[1], preferred_element_type=jnp.float32) + b_ref[2:3, :]
    o_ref[...] = out.astype(o_ref.dtype)


def _pad2(a, rows, cols):
    return jnp.pad(a, [(0, rows - a.shape[0]), (0, cols - a.shape[1])])


def control_net_forward(x, params, *, block_b=None):
    """x: [B, n_input]. params: dict of w1,b1,w2,b2,w3,b3 (weights as [in, out])."""
    B, n_in = x.shape
    n_hidden = params["w1"].shape[1]
    n_out = params["w3"].shape[1]

    # Padded feature width: lane-dense matmuls and stores.
    P = LANE * pl.cdiv(max(n_hidden, n_out), LANE)

    # Batch tile: cap at 128 rows to keep h1/h2 vreg pressure bounded, multiple of 8.
    if block_b is None:
        block_b = min(B, 128)
    block_b = max(8, min(block_b, B))
    if block_b != B:
        block_b = ((block_b + 7) // 8) * 8
    grid = (pl.cdiv(B, block_b),)

    # ---- Boundary packing: bf16 MXU operands, fused weight/bias slabs ----
    xb = x.astype(jnp.bfloat16)
    w1p = _pad2(params["w1"], n_in, P).astype(jnp.bfloat16)                 # [n_in, P]
    w23 = jnp.stack(
        [_pad2(params["w2"], P, P), _pad2(params["w3"], P, P)], axis=0
    ).astype(jnp.bfloat16)                                                  # [2, P, P]
    b_all = jnp.concatenate(
        [
            _pad2(params["b1"].reshape(1, -1), 1, P),
            _pad2(params["b2"].reshape(1, -1), 1, P),
            _pad2(params["b3"].reshape(1, -1), 1, P),
        ],
        axis=0,
    ).astype(jnp.float32)                                                   # [3, P]

    rep = lambda i: (0, 0)

    out_padded = pl.pallas_call(
        mlp_kernel,
        out_shape=jax.ShapeDtypeStruct((B, P), x.dtype),
        grid_spec=pltpu.PrefetchScalarGridSpec(
            num_scalar_prefetch=0,
            grid=grid,
            in_specs=[
                pl.BlockSpec((block_b, n_in), lambda i: (i, 0)),   # x: tiled over batch
                pl.BlockSpec((n_in, P), rep),                      # w1 (replicated)
                pl.BlockSpec((2, P, P), lambda i: (0, 0, 0)),      # w2+w3 slab (replicated)
                pl.BlockSpec((3, P), rep),                         # fused biases (replicated)
            ],
            out_specs=pl.BlockSpec((block_b, P), lambda i: (i, 0)),  # lane-dense output
        ),
        compiler_params=pltpu.CompilerParams(
            dimension_semantics=("parallel",),      # batch tiles shard across v7x cores
            vmem_limit_bytes=32 * 1024 * 1024,      # explicit budget (v7x has 64 MiB total)
        ),
    )(xb, w1p, w23, b_all)

    return out_padded[:, :n_out]


def init_control_net_params(key, n_input, n_hidden, n_output, dtype=jnp.float32):
    """Matches PyTorch init: weight ~ N(0, 0.001), bias = 0.
    Weights stored as [in, out] (transpose of PyTorch's [out, in])."""
    k1, k2, k3 = jax.random.split(key, 3)
    std = 0.001
    return {
        "w1": std * jax.random.normal(k1, (n_input, n_hidden), dtype=dtype),
        "b1": jnp.zeros((1, n_hidden), dtype=dtype),
        "w2": std * jax.random.normal(k2, (n_hidden, n_hidden), dtype=dtype),
        "b2": jnp.zeros((1, n_hidden), dtype=dtype),
        "w3": std * jax.random.normal(k3, (n_hidden, n_output), dtype=dtype),
        "b3": jnp.zeros((1, n_output), dtype=dtype),
    }


def control_net_ref(x, params):
    h1 = jnp.maximum(x @ params["w1"] + params["b1"], 0.0)
    h2 = jnp.maximum(h1 @ params["w2"] + params["b2"], 0.0)
    return h2 @ params["w3"] + params["b3"]


if __name__ == "__main__":
    key = jax.random.PRNGKey(0)
    k_param, k_x = jax.random.split(key)

    # Module shapes: ControlNet(n_input=8, n_hidden=32, n_output=4); B=256 gives a
    # 2-step batch grid (block_b=128) so the pipeline / megacore path is exercised.
    B, n_input, n_hidden, n_output = 256, 8, 32, 4

    params = init_control_net_params(k_param, n_input, n_hidden, n_output)
    x = jax.random.normal(k_x, (B, n_input), dtype=jnp.float32)

    out = control_net_forward(x, params)
    out = jax.block_until_ready(out)
    assert out.shape == (B, n_output), out.shape

    # Loose check vs the pure-f32 reference (bf16 operand quantization of tiny weights).
    ref32 = control_net_ref(x, params)
    assert jnp.allclose(out, ref32, rtol=5e-2, atol=2e-6), "mismatch vs f32 reference"

    # Tight check vs a reference using the same bf16-rounded operands (f32 accumulate).
    q = lambda a: a.astype(jnp.bfloat16).astype(jnp.float32)
    params_q = {k: (q(v) if k.startswith("w") else v) for k, v in params.items()}
    refq = control_net_ref(q(x), params_q)
    assert jnp.allclose(out, refq, rtol=1e-3, atol=1e-6), "mismatch vs bf16-quantized reference"

    print("KERNEL_OK")
</pallas_src>

<mosaic_0001>
module attributes {stable_mosaic.version = 11 : i64} {
  func.func @mlp_kernel(%arg0: i32, %arg1: memref<128x8xbf16, #tpu.memory_space<vmem>>, %arg2: memref<8x128xbf16, #tpu.memory_space<vmem>>, %arg3: memref<2x128x128xbf16, #tpu.memory_space<vmem>>, %arg4: memref<3x128xf32, #tpu.memory_space<vmem>>, %arg5: memref<128x128xf32, #tpu.memory_space<vmem>>) attributes {dimension_semantics = [#tpu.dimension_semantics<parallel>], iteration_bounds = array<i64: 2>, scalar_prefetch = 0 : i64, scratch_operands = 0 : i64, tpu.core_type = #tpu.core_type<tc>, window_params = [{transform_indices = @transform_0, window_bounds = array<i64: 128, 8>}, {pipeline_mode = #tpu.pipeline_mode<synchronous>, transform_indices = @transform_1, window_bounds = array<i64: 8, 128>}, {pipeline_mode = #tpu.pipeline_mode<synchronous>, transform_indices = @transform_2, window_bounds = array<i64: 2, 128, 128>}, {pipeline_mode = #tpu.pipeline_mode<synchronous>, transform_indices = @transform_3, window_bounds = array<i64: 3, 128>}, {transform_indices = @transform_4, window_bounds = array<i64: 128, 128>}]} {
    %c0 = arith.constant 0 : index
    %c0_0 = arith.constant 0 : index
    %0 = vector.load %arg1[%c0, %c0_0] : memref<128x8xbf16, #tpu.memory_space<vmem>>, vector<128x8xbf16>
    %c0_1 = arith.constant 0 : index
    %c0_2 = arith.constant 0 : index
    %1 = vector.load %arg2[%c0_1, %c0_2] : memref<8x128xbf16, #tpu.memory_space<vmem>>, vector<8x128xbf16>
    %cst = arith.constant dense<0.000000e+00> : vector<128x128xf32>
    %2 = tpu.matmul %0, %1, %cst {dimension_numbers = #tpu.dot_dimension_numbers<[1], [0], [0], [1], [0, 0, 1, 1], [], []>} : vector<128x8xbf16>, vector<8x128xbf16>, vector<128x128xf32> -> vector<128x128xf32>
    %c0_3 = arith.constant 0 : index
    %c0_4 = arith.constant 0 : index
    %3 = vector.load %arg4[%c0_3, %c0_4] : memref<3x128xf32, #tpu.memory_space<vmem>>, vector<1x128xf32>
    %4 = vector.broadcast %3 : vector<1x128xf32> to vector<128x128xf32>
    %5 = arith.addf %2, %4 : vector<128x128xf32>
    %cst_5 = arith.constant 0.000000e+00 : f32
    %6 = vector.broadcast %cst_5 : f32 to vector<128x128xf32>
    %7 = arith.maximumf %5, %6 : vector<128x128xf32>
    %8 = arith.truncf %7 : vector<128x128xf32> to vector<128x128xbf16>
    %c0_6 = arith.constant 0 : index
    %c0_7 = arith.constant 0 : index
    %c0_8 = arith.constant 0 : index
    %9 = vector.load %arg3[%c0_6, %c0_7, %c0_8] : memref<2x128x128xbf16, #tpu.memory_space<vmem>>, vector<1x128x128xbf16>
    %10 = vector.shape_cast %9 : vector<1x128x128xbf16> to vector<128x128xbf16>
    %cst_9 = arith.constant dense<0.000000e+00> : vector<128x128xf32>
    %11 = tpu.matmul %8, %10, %cst_9 {dimension_numbers = #tpu.dot_dimension_numbers<[1], [0], [0], [1], [0, 0, 1, 1], [], []>} : vector<128x128xbf16>, vector<128x128xbf16>, vector<128x128xf32> -> vector<128x128xf32>
    %c1 = arith.constant 1 : index
    %c0_10 = arith.constant 0 : index
    %12 = vector.load %arg4[%c1, %c0_10] : memref<3x128xf32, #tpu.memory_space<vmem>>, vector<1x128xf32>
    %13 = vector.broadcast %12 : vector<1x128xf32> to vector<128x128xf32>
    %14 = arith.addf %11, %13 : vector<128x128xf32>
    %cst_11 = arith.constant 0.000000e+00 : f32
    %15 = vector.broadcast %cst_11 : f32 to vector<128x128xf32>
    %16 = arith.maximumf %14, %15 : vector<128x128xf32>
    %17 = arith.truncf %16 : vector<128x128xf32> to vector<128x128xbf16>
    %c1_12 = arith.constant 1 : index
    %c0_13 = arith.constant 0 : index
    %c0_14 = arith.constant 0 : index
    %18 = vector.load %arg3[%c1_12, %c0_13, %c0_14] : memref<2x128x128xbf16, #tpu.memory_space<vmem>>, vector<1x128x128xbf16>
    %19 = vector.shape_cast %18 : vector<1x128x128xbf16> to vector<128x128xbf16>
    %cst_15 = arith.constant dense<0.000000e+00> : vector<128x128xf32>
    %20 = tpu.matmul %17, %19, %cst_15 {dimension_numbers = #tpu.dot_dimension_numbers<[1], [0], [0], [1], [0, 0, 1, 1], [], []>} : vector<128x128xbf16>, vector<128x128xbf16>, vector<128x128xf32> -> vector<128x128xf32>
    %c2 = arith.constant 2 : index
    %c0_16 = arith.constant 0 : index
    %21 = vector.load %arg4[%c2, %c0_16] : memref<3x128xf32, #tpu.memory_space<vmem>>, vector<1x128xf32>
    %22 = vector.broadcast %21 : vector<1x128xf32> to vector<128x128xf32>
    %23 = arith.addf %20, %22 : vector<128x128xf32>
    %c0_17 = arith.constant 0 : index
    %c0_18 = arith.constant 0 : index
    %24 = vector.load %arg5[%c0_17, %c0_18] : memref<128x128xf32, #tpu.memory_space<vmem>>, vector<128x128xf32>
    tpu.vector_store %arg5[%c0_17, %c0_18], %23 {strides = array<i32>} : memref<128x128xf32, #tpu.memory_space<vmem>>, vector<128x128xf32>,
    return
  }
  func.func @transform_0(%arg0: i32) -> (i32, i32) {
    %c0_i32 = arith.constant 0 : i32
    %c0_i32_0 = arith.constant 0 : i32
    return %arg0, %c0_i32 : i32, i32
  }
  func.func @transform_1(%arg0: i32) -> (i32, i32) {
    %c0_i32 = arith.constant 0 : i32
    %c0_i32_0 = arith.constant 0 : i32
    %c0_i32_1 = arith.constant 0 : i32
    return %c0_i32, %c0_i32_0 : i32, i32
  }
  func.func @transform_2(%arg0: i32) -> (i32, i32, i32) {
    %c0_i32 = arith.constant 0 : i32
    %c0_i32_0 = arith.constant 0 : i32
    %c0_i32_1 = arith.constant 0 : i32
    %c0_i32_2 = arith.constant 0 : i32
    return %c0_i32, %c0_i32_0, %c0_i32_1 : i32, i32, i32
  }
  func.func @transform_3(%arg0: i32) -> (i32, i32) {
    %c0_i32 = arith.constant 0 : i32
    %c0_i32_0 = arith.constant 0 : i32
    %c0_i32_1 = arith.constant 0 : i32
    return %c0_i32, %c0_i32_0 : i32, i32
  }
  func.func @transform_4(%arg0: i32) -> (i32, i32) {
    %c0_i32 = arith.constant 0 : i32
    %c0_i32_0 = arith.constant 0 : i32
    return %arg0, %c0_i32 : i32, i32
  }
}

</mosaic_0001>

<bundles_post_ra>
// kernel: tpu_custom_call.1
= control target key start
LH: loop header
LB: loop body
LE: loop exit
PB: predicated region body
PF: predicated region fallthrough
CT: control target
= control target key end

     0   :  { %9 = vsyncpa [#allocation3], 0  ;;  %s1396_s0 = inlined_call_operand.vmem [shape: bf16[256,8], index: 0, kind: input, shape index: {}]   ;;  %s1397_s1 = inlined_call_operand.vmem [shape: bf16[8,128], index: 1, kind: input, shape index: {}]   ;;  %s1398_s2 = inlined_call_operand.vmem [shape: bf16[2,128,128], index: 2, kind: input, shape index: {}]   ;;  %s1399_s3 = inlined_call_operand.vmem [shape: f32[3,128], index: 3, kind: input, shape index: {}]   ;;  %s1400_s4 = inlined_call_operand.hbm [shape: f32[256,128], index: 4, kind: output, shape index: {}]  }
   0x1   :  { %11 = vsyncpa [#allocation3 + $0x1], 0  ;;  %s1204_s15 = smov 0   ;;  %s1206_s16 = smov 0  }
   0x2   :  { %s1208_s17 = smov 0   ;;  %s1210_s18 = smov 0  }
   0x3 LB: > { %s1225_s19 = sadd.s32 4294967295, %s1174_s18   ;;  %s861_s20 = sadd.s32 4294967294, %s1174_s18   ;;  %s1174_s18 = sphi %s1210_s18, %s1406_s18   ;;  %s1170_s17 = sphi %s1208_s17, %s1405_s17   ;;  %s1166_s16 = sphi %s1206_s16, %s1404_s16   ;;  %s1162_s15 = sphi %s1204_s15, %s1403_s15  }
   0x4   : > { %s1229_s21 = sadd.s32 1, %s1174_s18   ;;  %s113_s22 = sadd.s32 1, %s1170_s17 }
   0x5   : > { %s110_s23 = ssub.s32 %s1174_s18, %s1229_s21  ;;  %p123_p0 = scmp.ne.s32.totalorder %s1170_s17, %s1166_s16 }
   0x6   : > { %p111_p1 = scmp.eq.s32.totalorder %s110_s23, 0  ;;  %p124_p2 = scmp.eq.s32.totalorder %s1225_s19, 1 }
   0x7   : > { %p129_p3 = scmp.ne.s32.totalorder %s1166_s16, %s1162_s15  ;;  %p130_p4 = scmp.eq.s32.totalorder %s861_s20, 1 }
   0x8   : > { %s1240_s24 = scalar_select %p111_p1, %s1170_s17, %s113_s22  }
   0x9   : > { %p1242_p5 = por %p124_p2, %p123_p0  ;;  %p1246_p6 = por %p130_p4, %p129_p3 }
   0xa   : > { %p864_p7 = scmp.ge.s32.totalorder %s1174_s18, 1  ;;  %p166_p8 = scmp.lt.s32.totalorder %s1174_s18, 3 }
   0xc   : > { %p167_p9 = pnand %p864_p7, %p166_p8 }
   0xd   : > { %s866_s29 = sshll.u32 (!%p167_p9), %s1225_s19, 4  ;;  %s924_s20 = sshll.u32 (!%p167_p9), %s1225_s19, 11 }
   0xe   : > { %170 = sbr.rel (%p167_p9) target bundleno = 675 (0x2a3), region = 36  ;;  %p193_p10 = scmp.lt.s32.totalorder (!%p167_p9), %s866_s29, 31 }
   0xf   : > { %s1348_s28 = scalar_lea.hbm (!%p167_p9), %s1400_s4, %s924_s20  ;;  %s1176_s30 = smov (!%p167_p9), [#allocation2]  }
  0x10   : > { %s1118_s5 = sshll.u32 (!%p167_p9), %s1176_s30, 4  ;;  %s1119_s5 = int_to_ptr.vmem [resolvable:$false] %s1118_s5 }
  0x11   : > { %s1120_s6 = scalar_lea.vmem (!%p167_p9), %s1119_s5, 4096 }
  0x13   : > { %v216_v0 = vld [vmem:[%s1397_s1] sm:$0xf]  ;;  %vm287_vm0 = vcmask 1043456   ;;  %v1098_v1 = vld [vmem:[%s1398_s2 + $0x38] sm:$0xff]   ;;  %v1099_v3 = vld [vmem:[%s1398_s2 + $0x30] sm:$0xff]   ;;  %s1408_s29 = smov (!%p193_p10, %s866_s29), 31 }
  0x14   : > { %1048 = vmatprep.subr.msk.bf16.mxu0 %vm287_vm0, %v216_v0  ;;  %v289_v2 = vsel %vm287_vm0, %v216_v0, 0  ;;  %984 = vmatprep.subr.bf16.mxu1 %v1098_v1  ;;  %v1100_v4 = vld [vmem:[%s1398_s2 + $0x28] sm:$0xff]   ;;  %s867_s10 = sshll.u32 %s1408_s29, 2  ;;  %vm262_vm1 = vcmask 64512   ;;  %v1101_v5 = vld [vmem:[%s1398_s2 + $0x20] sm:$0xff]   ;;  %v1102_v9 = vld [vmem:[%s1398_s2 + $0x18] sm:$0xff]  }
  0x15   : > { %967 = vmatpush3.bf16.msra.mxu0 %v289_v2  ;;  %985 = vmatpush3.bf16.msra.mxu1 %v1098_v1  ;;  %s196_s13 = scalar_lea.vmem %s1396_s0, %s867_s10  ;;  %v1103_v15 = vld [vmem:[%s1398_s2 + $0x10] sm:$0xff]   ;;  %v1104_v16 = vld [vmem:[%s1398_s2 + $0x8] sm:$0xff]   ;;  %v1105_v17 = vld [vmem:[%s1398_s2] sm:$0xff]   ;;  %s189_s10 = sand.u32 1, %s1166_s16  }
  0x16   : > { %986 = vmatprep.subr.bf16.mxu1 %v1099_v3  ;;  %v1090_v6 = vld [vmem:[%s196_s13] sm:$0xff]   ;;  %v1091_v7 = vld [vmem:[%s196_s13 + $0x8] sm:$0xff]   ;;  %v1092_v8 = vld [vmem:[%s196_s13 + $0x10] sm:$0xff]   ;;  %s865_s11 = sshll.u32 %s189_s10, 7  ;;  %s1356_s19 = scalar_lea.sflag [#allocation3], %s189_s10 }
  0x17   : > { %968 = vmatprep.mubr.msk.bf16.mxu0 %vm262_vm1, %v1090_v6  ;;  %v1093_v10 = vld [vmem:[%s196_s13 + $0x18] sm:$0xff]   ;;  %v1094_v11 = vld [vmem:[%s196_s13 + $0x20] sm:$0xff]   ;;  %v1095_v12 = vld [vmem:[%s196_s13 + $0x28] sm:$0xff]   ;;  %s1327_s14 = scalar_lea.vmem [#allocation2], %s865_s11 }
  0x18   : > { %969 = vmatmul.mubr.msk.bf16.vlgmr.msra.gmra.mxu0 %vm262_vm1, %v1091_v7  ;;  %v1096_v13 = vld [vmem:[%s196_s13 + $0x30] sm:$0xff]   ;;  %v1097_v14 = vld [vmem:[%s196_s13 + $0x38] sm:$0xff]   ;;  %v1108_v20 = vld [vmem:[%s1398_s2 + $0x68] sm:$0xff]   ;;  %s799_s22 = sshll.u32 %s1327_s14, 4  ;;  %s1350_s22 = int_to_ptr.vmem [resolvable:$true] %s799_s22 }
  0x19   : > { %987 = vmatpush3.bf16.msra.mxu1 %v1099_v3  ;;  %972 = vmatprep.mubr.msk.bf16.mxu0 %vm262_vm1, %v1092_v8  ;;  %v1106_v18 = vld [vmem:[%s1398_s2 + $0x78] sm:$0xff]   ;;  %v1107_v19 = vld [vmem:[%s1398_s2 + $0x70] sm:$0xff]   ;;  %v1109_v21 = vld [vmem:[%s1398_s2 + $0x60] sm:$0xff]   ;;  %s1114_s29 = scalar_lea.vmem %s1350_s22, 2048  ;;  %p1121_p0 = scmp.lt.s32.totalorder %s1350_s22, %s1119_s5 }
  0x1a   : > { %988 = vmatprep.subr.bf16.mxu1 %v1100_v4  ;;  %1016 = vmatprep.subr.bf16.mxu0 %v1106_v18  ;;  %v1110_v22 = vld [vmem:[%s1398_s2 + $0x58] sm:$0xff]   ;;  %v868_v25 = vld [vmem:[%s1399_s3] ss:$0 sm:$0xff]  ;;  %p1115_p11 = scmp.ne.s32.totalorder %s1350_s22, %s1114_s29  ;;  %p1122_p1 = scmp.lt.s32.totalorder %s1120_s6, %s1114_s29 }
  0x1b   : > { %1017 = vmatpush3.bf16.msra.mxu0 %v1106_v18  ;;  %v1113_v18 = vld [vmem:[%s1398_s2 + $0x40] sm:$0xff]  }
  0x1c   : > { %1018 = vmatprep.subr.bf16.mxu0 %v1107_v19  ;;  %p1116_p12 = pnand %p1115_p11, %p1242_p5  ;;  %p1123_p2 = por %p1122_p1, %p1121_p0 }
  0x1d   : > { %989 = vmatpush3.bf16.msra.mxu1 %v1100_v4 }
  0x1e   : > { %990 = vmatprep.subr.bf16.mxu1 %v1101_v5  ;;  %p1117_p13 = pneg %p1116_p12 }
  0x1f   : > { %1019 = vmatpush3.bf16.msra.mxu0 %v1107_v19 }
  0x20   : > { %973 = vmatmul.mubr.msk.bf16.gmra.mxu0 %vm262_vm1, %v1093_v10  ;;  %1020 = vmatprep.subr.bf16.mxu0 %v1108_v20  ;;  %p1124_p3 = pnand %p1123_p2, %p1117_p13 }
  0x21   : > { %991 = vmatpush3.bf16.msra.mxu1 %v1101_v5  ;;  %976 = vmatprep.mubr.msk.bf16.mxu0 %vm262_vm1, %v1094_v11 }
  0x22   : > { %992 = vmatprep.subr.bf16.mxu1 %v1102_v9 }
  0x23   : > { %1021 = vmatpush3.bf16.msra.mxu0 %v1108_v20 }
  0x24   : > { %1022 = vmatprep.subr.bf16.mxu0 %v1109_v21 }
  0x25   : > { %993 = vmatpush3.bf16.msra.mxu1 %v1102_v9 }
  0x26   : > { %994 = vmatprep.subr.bf16.mxu1 %v1103_v15 }
  0x27   : > { %1023 = vmatpush3.bf16.msra.mxu0 %v1109_v21  ;;  %v885_v21 = vld [vmem:[%s1399_s3 + $0x1] ss:$0 sm:$0xff] }
  0x28   : > { %977 = vmatmul.mubr.msk.bf16.gmra.mxu0 %vm262_vm1, %v1095_v12  ;;  %1024 = vmatprep.subr.bf16.mxu0 %v1110_v22 }
  0x29   : > { %980 = vmatprep.mubr.msk.bf16.mxu0 %vm262_vm1, %v1096_v13  ;;  %995 = vmatpush3.bf16.msra.mxu1 %v1103_v15 }
  0x2a   : > { %996 = vmatprep.subr.bf16.mxu1 %v1104_v16 }
  0x2b   : > { %1025 = vmatpush3.bf16.msra.mxu0 %v1110_v22 }
  0x2d   : > { %997 = vmatpush3.bf16.msra.mxu1 %v1104_v16  ;;  %v1111_v16 = vld [vmem:[%s1398_s2 + $0x50] sm:$0xff]  }
  0x2e   : > { %998 = vmatprep.subr.bf16.mxu1 %v1105_v17  ;;  %1026 = vmatprep.subr.bf16.mxu0 %v1111_v16 }
  0x2f   : > { %1027 = vmatpush3.bf16.msra.mxu0 %v1111_v16 }
  0x30   : > { %981 = vmatmul.mubr.msk.bf16.gmra.mxu0 %vm262_vm1, %v1097_v14 }
  0x31   : > { %999 = vmatpush3.bf16.msra.mxu1 %v1105_v17  ;;  %v1112_v17 = vld [vmem:[%s1398_s2 + $0x48] sm:$0xff]  }
  0x32   : > { %1028 = vmatprep.subr.bf16.mxu0 %v1112_v17 }
  0x33   : > { %1029 = vmatpush3.bf16.msra.mxu0 %v1112_v17 }
  0x34   : > { %1030 = vmatprep.subr.bf16.mxu0 %v1113_v18 }
  0x37   : > { %1031 = vmatpush3.bf16.msra.mxu0 %v1113_v18 }
  0xd8   : > { %v970_v23 = vpop.f32.mrf.mxu0 }
  0xd9   : > { %v334_v29 = vadd.f32 %v970_v23, %v868_v25 }
  0xda   : > { %v325_v24 = vpop.f32.mrf.mxu0 }
  0xdb   : > { %v326_v27 = vadd.f32 %v868_v25, %v325_v24  ;;  %v390_v36 = vmax.f32 %v334_v29, 0.0 }
  0xdc   : > { %v971_v26 = vpop.f32.mrf.mxu0 }
  0xdd   : > { %v337_v28 = vadd.f32 %v971_v26, %v868_v25  ;;  %v388_v34 = vmax.f32 %v326_v27, 0.0 }
  0xde   : > { %v328_v30 = vpop.f32.mrf.mxu0 }
  0xdf   : > { %v329_v31 = vadd.f32 %v868_v25, %v328_v30  ;;  %v391_v32 = vmax.f32 %v337_v28, 0.0 }
  0xe0   : > { %v974_v33 = vpop.f32.mrf.mxu0 }
  0xe1   : > { %v389_v35 = vmax.f32 %v329_v31, 0.0  ;;  %v405_v39 = vpack.c.bf16 %v391_v32, %v390_v36  ;;  %v350_v43 = vadd.f32 %v974_v33, %v868_v25 }
  0xe2   : > { %v341_v37 = vpop.f32.mrf.mxu0 }
  0xe3   : > { %v404_v38 = vpack.c.bf16 %v389_v35, %v388_v34  ;;  %v342_v41 = vadd.f32 %v868_v25, %v341_v37  ;;  %v394_v50 = vmax.f32 %v350_v43, 0.0 }
  0xe4   : > { %v975_v40 = vpop.f32.mrf.mxu0 }
  0xe5   : > { %v353_v42 = vadd.f32 %v975_v40, %v868_v25  ;;  %1000 = vmatprep.mubr.bf16.mxu1 %v404_v38  ;;  %v392_v48 = vmax.f32 %v342_v41, 0.0 }
  0xe6   : > { %v344_v44 = vpop.f32.mrf.mxu0  ;;  %1001 = vmatmul.mubr.bf16.vlgmr.msra.gmra.mxu1 %v405_v39 }
  0xe7   : > { %v345_v45 = vadd.f32 %v868_v25, %v344_v44  ;;  %v395_v46 = vmax.f32 %v353_v42, 0.0 }
  0xe8   : > { %v978_v47 = vpop.f32.mrf.mxu0 }
  0xe9   : > { %v393_v49 = vmax.f32 %v345_v45, 0.0  ;;  %v407_v53 = vpack.c.bf16 %v395_v46, %v394_v50  ;;  %v366_v57 = vadd.f32 %v978_v47, %v868_v25 }
  0xea   : > { %v357_v51 = vpop.f32.mrf.mxu0 }
  0xeb   : > { %v406_v52 = vpack.c.bf16 %v393_v49, %v392_v48  ;;  %v358_v55 = vadd.f32 %v868_v25, %v357_v51  ;;  %v398_v0 = vmax.f32 %v366_v57, 0.0 }
  0xec   : > { %v979_v54 = vpop.f32.mrf.mxu0 }
  0xed   : > { %v369_v56 = vadd.f32 %v979_v54, %v868_v25  ;;  %1004 = vmatprep.mubr.bf16.mxu1 %v406_v52  ;;  %v396_v62 = vmax.f32 %v358_v55, 0.0 }
  0xee   : > { %v360_v58 = vpop.f32.mrf.mxu0  ;;  %1005 = vmatmul.mubr.bf16.gmra.mxu1 %v407_v53 }
  0xef   : > { %v361_v59 = vadd.f32 %v868_v25, %v360_v58  ;;  %v399_v60 = vmax.f32 %v369_v56, 0.0 }
  0xf0   : > { %v982_v61 = vpop.f32.mrf.mxu0 }
  0xf1   : > { %v397_v63 = vmax.f32 %v361_v59, 0.0  ;;  %v409_v3 = vpack.c.bf16 %v399_v60, %v398_v0  ;;  %v382_v7 = vadd.f32 %v982_v61, %v868_v25 }
  0xf2   : > { %v373_v1 = vpop.f32.mrf.mxu0 }
  0xf3   : > { %v408_v2 = vpack.c.bf16 %v397_v63, %v396_v62  ;;  %v374_v5 = vadd.f32 %v868_v25, %v373_v1  ;;  %v402_v13 = vmax.f32 %v382_v7, 0.0 }
  0xf4   : > { %v983_v4 = vpop.f32.mrf.mxu0 }
  0xf5   : > { %v385_v6 = vadd.f32 %v983_v4, %v868_v25  ;;  %1008 = vmatprep.mubr.bf16.mxu1 %v408_v2  ;;  %v400_v11 = vmax.f32 %v374_v5, 0.0 }
  0xf6   : > { %v376_v8 = vpop.f32.mrf.mxu0  ;;  %1009 = vmatmul.mubr.bf16.gmra.mxu1 %v409_v3 }
  0xf7   : > { %v377_v9 = vadd.f32 %v868_v25, %v376_v8  ;;  %v403_v10 = vmax.f32 %v385_v6, 0.0 }
  0xf9   : > { %v401_v12 = vmax.f32 %v377_v9, 0.0  ;;  %v411_v15 = vpack.c.bf16 %v403_v10, %v402_v13 }
  0xfb   : > { %v410_v14 = vpack.c.bf16 %v401_v12, %v400_v11  ;;  %v910_v12 = vld [vmem:[%s1399_s3 + $0x2] ss:$0 sm:$0xff] }
  0xfd   : > { %1012 = vmatprep.mubr.bf16.mxu1 %v410_v14 }
  0xfe   : > { %1013 = vmatmul.mubr.bf16.gmra.mxu1 %v411_v15 }
 0x1a6   : > { %v1002_v19 = vpop.f32.mrf.mxu1 }
 0x1a7   : > { %v524_v25 = vadd.f32 %v1002_v19, %v885_v21 }
 0x1a8   : > { %v515_v20 = vpop.f32.mrf.mxu1 }
 0x1a9   : > { %v516_v23 = vadd.f32 %v885_v21, %v515_v20  ;;  %v580_v32 = vmax.f32 %v524_v25, 0.0 }
 0x1aa   : > { %v1003_v22 = vpop.f32.mrf.mxu1 }
 0x1ab   : > { %v527_v24 = vadd.f32 %v1003_v22, %v885_v21  ;;  %v578_v30 = vmax.f32 %v516_v23, 0.0 }
 0x1ac   : > { %v518_v26 = vpop.f32.mrf.mxu1 }
 0x1ad   : > { %v519_v27 = vadd.f32 %v885_v21, %v518_v26  ;;  %v581_v28 = vmax.f32 %v527_v24, 0.0 }
 0x1ae   : > { %v1006_v29 = vpop.f32.mrf.mxu1 }
 0x1af   : > { %v579_v31 = vmax.f32 %v519_v27, 0.0  ;;  %v595_v35 = vpack.c.bf16 %v581_v28, %v580_v32  ;;  %v540_v39 = vadd.f32 %v1006_v29, %v885_v21 }
 0x1b0   : > { %v531_v33 = vpop.f32.mrf.mxu1 }
 0x1b1   : > { %v594_v34 = vpack.c.bf16 %v579_v31, %v578_v30  ;;  %v532_v37 = vadd.f32 %v885_v21, %v531_v33  ;;  %v584_v46 = vmax.f32 %v540_v39, 0.0 }
 0x1b2   : > { %v1007_v36 = vpop.f32.mrf.mxu1 }
 0x1b3   : > { %v543_v38 = vadd.f32 %v1007_v36, %v885_v21  ;;  %1032 = vmatprep.mubr.bf16.mxu0 %v594_v34  ;;  %v582_v44 = vmax.f32 %v532_v37, 0.0 }
 0x1b4   : > { %v534_v40 = vpop.f32.mrf.mxu1  ;;  %1033 = vmatmul.mubr.bf16.vlgmr.msra.gmra.mxu0 %v595_v35 }
 0x1b5   : > { %v535_v41 = vadd.f32 %v885_v21, %v534_v40  ;;  %v585_v42 = vmax.f32 %v543_v38, 0.0 }
 0x1b6   : > { %v1010_v43 = vpop.f32.mrf.mxu1 }
 0x1b7   : > { %v583_v45 = vmax.f32 %v535_v41, 0.0  ;;  %v597_v49 = vpack.c.bf16 %v585_v42, %v584_v46  ;;  %v556_v53 = vadd.f32 %v1010_v43, %v885_v21 }
 0x1b8   : > { %v547_v47 = vpop.f32.mrf.mxu1 }
 0x1b9   : > { %v596_v48 = vpack.c.bf16 %v583_v45, %v582_v44  ;;  %v548_v51 = vadd.f32 %v885_v21, %v547_v47  ;;  %v588_v60 = vmax.f32 %v556_v53, 0.0 }
 0x1ba   : > { %v1011_v50 = vpop.f32.mrf.mxu1 }
 0x1bb   : > { %v559_v52 = vadd.f32 %v1011_v50, %v885_v21  ;;  %1036 = vmatprep.mubr.bf16.mxu0 %v596_v48  ;;  %v586_v58 = vmax.f32 %v548_v51, 0.0 }
 0x1bc   : > { %v550_v54 = vpop.f32.mrf.mxu1  ;;  %1037 = vmatmul.mubr.bf16.gmra.mxu0 %v597_v49 }
 0x1bd   : > { %v551_v55 = vadd.f32 %v885_v21, %v550_v54  ;;  %v589_v56 = vmax.f32 %v559_v52, 0.0 }
 0x1be   : > { %v1014_v57 = vpop.f32.mrf.mxu1 }
 0x1bf   : > { %v587_v59 = vmax.f32 %v551_v55, 0.0  ;;  %v599_v63 = vpack.c.bf16 %v589_v56, %v588_v60  ;;  %v572_v3 = vadd.f32 %v1014_v57, %v885_v21 }
 0x1c0   : > { %v563_v61 = vpop.f32.mrf.mxu1 }
 0x1c1   : > { %v598_v62 = vpack.c.bf16 %v587_v59, %v586_v58  ;;  %v564_v1 = vadd.f32 %v885_v21, %v563_v61  ;;  %v592_v9 = vmax.f32 %v572_v3, 0.0 }
 0x1c2   : > { %v1015_v0 = vpop.f32.mrf.mxu1 }
 0x1c3   : > { %v575_v2 = vadd.f32 %v1015_v0, %v885_v21  ;;  %1040 = vmatprep.mubr.bf16.mxu0 %v598_v62  ;;  %v590_v7 = vmax.f32 %v564_v1, 0.0 }
 0x1c4   : > { %v566_v4 = vpop.f32.mrf.mxu1  ;;  %1041 = vmatmul.mubr.bf16.gmra.mxu0 %v599_v63 }
 0x1c5   : > { %v567_v5 = vadd.f32 %v885_v21, %v566_v4  ;;  %v593_v6 = vmax.f32 %v575_v2, 0.0 }
 0x1c7   : > { %v591_v8 = vmax.f32 %v567_v5, 0.0  ;;  %v601_v11 = vpack.c.bf16 %v593_v6, %v592_v9 }
 0x1c9   : > { %v600_v10 = vpack.c.bf16 %v591_v8, %v590_v7 }
 0x1cb   : > { %1044 = vmatprep.mubr.bf16.mxu0 %v600_v10 }
 0x1cc   : > { %1045 = vmatmul.mubr.bf16.gmra.mxu0 %v601_v11 }
 0x274   : > { %v1034_v13 = vpop.f32.mrf.mxu0 }
 0x275   : > { %v715_v14 = vadd.f32 %v1034_v13, %v910_v12 }
 0x276   : > { %v706_v15 = vpop.f32.mrf.mxu0 }
 0x277   : > { %771 = vst [vmem:[%s1327_s14 + $0x10] sm:$0xff] %v715_v14  ;;  %v707_v16 = vadd.f32 %v910_v12, %v706_v15 }
 0x278   : > { %v1035_v17 = vpop.f32.mrf.mxu0 }
 0x279   : > { %769 = vst [vmem:[%s1327_s14] sm:$0xff] %v707_v16  ;;  %v718_v18 = vadd.f32 %v1035_v17, %v910_v12 }
 0x27a   : > { %v709_v19 = vpop.f32.mrf.mxu0 }
 0x27b   : > { %772 = vst [vmem:[%s1327_s14 + $0x18] sm:$0xff] %v718_v18  ;;  %v710_v20 = vadd.f32 %v910_v12, %v709_v19 }
 0x27c   : > { %v1038_v21 = vpop.f32.mrf.mxu0 }
 0x27d   : > { %770 = vst [vmem:[%s1327_s14 + $0x8] sm:$0xff] %v710_v20  ;;  %v731_v22 = vadd.f32 %v1038_v21, %v910_v12 }
 0x27e   : > { %v722_v23 = vpop.f32.mrf.mxu0 }
 0x27f   : > { %775 = vst [vmem:[%s1327_s14 + $0x30] sm:$0xff] %v731_v22  ;;  %v723_v24 = vadd.f32 %v910_v12, %v722_v23 }
 0x280   : > { %v1039_v25 = vpop.f32.mrf.mxu0 }
 0x281   : > { %773 = vst [vmem:[%s1327_s14 + $0x20] sm:$0xff] %v723_v24  ;;  %v734_v26 = vadd.f32 %v1039_v25, %v910_v12 }
 0x282   : > { %v725_v27 = vpop.f32.mrf.mxu0 }
 0x283   : > { %776 = vst [vmem:[%s1327_s14 + $0x38] sm:$0xff] %v734_v26  ;;  %v726_v28 = vadd.f32 %v910_v12, %v725_v27 }
 0x284   : > { %v1042_v29 = vpop.f32.mrf.mxu0 }
 0x285   : > { %774 = vst [vmem:[%s1327_s14 + $0x28] sm:$0xff] %v726_v28  ;;  %v747_v30 = vadd.f32 %v1042_v29, %v910_v12 }
 0x286   : > { %v738_v31 = vpop.f32.mrf.mxu0 }
 0x287   : > { %779 = vst [vmem:[%s1327_s14 + $0x50] sm:$0xff] %v747_v30  ;;  %v739_v32 = vadd.f32 %v910_v12, %v738_v31 }
 0x288   : > { %v1043_v33 = vpop.f32.mrf.mxu0 }
 0x289   : > { %777 = vst [vmem:[%s1327_s14 + $0x40] sm:$0xff] %v739_v32  ;;  %v750_v34 = vadd.f32 %v1043_v33, %v910_v12 }
 0x28a   : > { %v741_v35 = vpop.f32.mrf.mxu0 }
 0x28b   : > { %780 = vst [vmem:[%s1327_s14 + $0x58] sm:$0xff] %v750_v34  ;;  %v742_v36 = vadd.f32 %v910_v12, %v741_v35 }
 0x28c   : > { %v1046_v37 = vpop.f32.mrf.mxu0 }
 0x28d   : > { %778 = vst [vmem:[%s1327_s14 + $0x48] sm:$0xff] %v742_v36  ;;  %v763_v38 = vadd.f32 %v1046_v37, %v910_v12 }
 0x28e   : > { %v754_v39 = vpop.f32.mrf.mxu0 }
 0x28f   : > { %783 = vst [vmem:[%s1327_s14 + $0x70] sm:$0xff] %v763_v38  ;;  %v755_v40 = vadd.f32 %v910_v12, %v754_v39 }
 0x290   : > { %v1047_v41 = vpop.f32.mrf.mxu0 }
 0x291   : > { %781 = vst [vmem:[%s1327_s14 + $0x60] sm:$0xff] %v755_v40  ;;  %v766_v42 = vadd.f32 %v1047_v41, %v910_v12 }
 0x292   : > { %v757_v43 = vpop.f32.mrf.mxu0 }
 0x293   : > { %784 = vst [vmem:[%s1327_s14 + $0x78] sm:$0xff] %v766_v42  ;;  %v758_v44 = vadd.f32 %v910_v12, %v757_v43 }
 0x295   : > { %782 = vst [vmem:[%s1327_s14 + $0x68] sm:$0xff] %v758_v44 }
 0x296   : > { %1127 = shalt.err (!%p1124_p3)
}
 0x297   : > { %s1128_s7 = scalar_lea.hbm %s1348_s28, 2048  ;;  %s1132_s10 = scalar_lea.hbm %s1400_s4, 4096 }
 0x298   : > { %p1129_p4 = scmp.ne.s32.totalorder %s1348_s28, %s1128_s7  ;;  %p1133_p9 = scmp.lt.s32.totalorder %s1348_s28, %s1400_s4 }
 0x299   : > { %p1134_p10 = scmp.lt.s32.totalorder %s1132_s10, %s1128_s7 }
 0x29a   : > { %p1130_p7 = pnand %p1129_p4, %p1242_p5 }
 0x29b   : > { %p1135_p11 = por %p1134_p10, %p1133_p9 }
 0x29c   : > { %p1131_p8 = pneg %p1130_p7 }
 0x29e   : > { %p1136_p12 = pnand %p1135_p11, %p1131_p8 }
 0x2a0   : > { %1139 = shalt.err (!%p1136_p12)
}
 0x2a1   : > { %s1177_s13 = smov 128   ;;  %s1178_s14 = smov 8  }
 0x2a2   : > { %1049 = dma.vmem_to_hbm [thread:$0]  (%p1242_p5), %s1350_s22, 2048, %s1348_s28, %s1356_s19, %s1177_s13, %s1177_s13, %s1178_s14  }
 0x2a3 PF: > { %p1055_p13 = scmp.ge.s32.totalorder %s1174_s18, 2  ;;  %s814_s20 = sand.u32 1, %s1162_s15  }
 0x2a4   : > { %s815_s23 = scalar_lea.sflag [#allocation3], %s814_s20 }
 0x2a5   : > { %p1052_p0 = pnand %p1055_p13, %p1246_p6 }
 0x2a7   : > { %p1053_p1 = pneg %p1052_p0 }
 0x2a9   : > { %1157 = dma.done.wait (%p1053_p1), %s815_s23, 2048  }
 0x2aa   : > { %1159 = vsyncadd (%p1053_p1), %s815_s23, 4294965248  ;;  %p14_p2 = scmp.ge.s32.totalorder %s1229_s21, 4   ;;  %s1403_s15 = smov %s1166_s16 }
 0x2ab   : > { %s1404_s16 = smov %s1170_s17  ;;  %s1405_s17 = smov %s1240_s24 }
 0x2ac   : > { %s1406_s18 = smov %s1229_s21  ;;  %16 = sbr.rel (!%p14_p2) target bundleno = 3 (0x3), region = 72 }
 0x2b1   :  { %820 = vsyncpa [#allocation3], 1 }
 0x2b2   :  { %822 = vsyncpa [#allocation3 + $0x1], 1 }

</bundles_post_ra>
